<compile_context>
chip_gen: v5e
topology: v5e:2x2
jax: 0.10.0
libtpu: 0.0.40
codegen_flags: <defaults>
</compile_context>

<pallas_src>
import math

import jax
import jax.numpy as jnp
from jax.experimental import pallas as pl
from jax.experimental.pallas import tpu as pltpu

# Logical (PyTorch) dimensions.
OBS_DIM = 16        # config['env_obs_dim']
H1 = 400
H2 = 300
ACTION_DIM = 8      # config['action_dim']

# Padded (kernel) dimensions — lane/MXU friendly multiples of 128.
H1P = 512           # 400 -> 512
H2P = 384           # 300 -> 384  (review: was 512; zero columns were waste)
ADP = 128           # 8   -> 128  (lane-dense output stores, no vst.msk)

_MAX_BLOCK_B = 512  # rows per grid step; 512x512 f32 intermediate ≈ 1 MiB


def _actor_kernel(x_ref, w1_ref, b1_ref, w2_ref, b2_ref, w3_ref, b3_ref,
                  o_ref):
    # Dots take bf16 inputs (native MXU dtype on v5e/v6e/v7x) and accumulate
    # in f32; bias add, ReLU and tanh stay in f32 on the VPU/EUP.
    x = x_ref[...].astype(jnp.bfloat16)
    # Layer 1: Linear(obs, 512p) + ReLU
    h = jnp.dot(x, w1_ref[...],
                preferred_element_type=jnp.float32) + b1_ref[...]
    h = jnp.maximum(h, 0.0)
    # Layer 2: Linear(512p, 384p) + ReLU
    h = jnp.dot(h.astype(jnp.bfloat16), w2_ref[...],
                preferred_element_type=jnp.float32) + b2_ref[...]
    h = jnp.maximum(h, 0.0)
    # Layer 3: Linear(384p, 128p) + tanh   (tanh -> EUP)
    h = jnp.dot(h.astype(jnp.bfloat16), w3_ref[...],
                preferred_element_type=jnp.float32) + b3_ref[...]
    o_ref[...] = jnp.tanh(h).astype(o_ref.dtype)


def _choose_batch_tiling(B):
    """Return (block_b, n_blocks).

    Small B: one sublane-aligned tile covering the whole batch.
    Large B: <=512-row tiles with an even number of grid steps so v7x's two
    TensorCores split the 'parallel' grid axis evenly (no odd-step tail)."""
    Bp = 8 * math.ceil(B / 8)                    # sublane alignment
    if Bp <= _MAX_BLOCK_B:
        return Bp, 1
    n = math.ceil(Bp / _MAX_BLOCK_B)
    if n % 2:                                    # even step count for v7x
        n += 1
    block_b = 8 * math.ceil(Bp / (8 * n))        # per-step rows, 8-aligned
    return block_b, n


@jax.jit
def ddpg_actor_forward(x, packed_params):
    """x: (B, OBS_DIM) float32 -> (B, ACTION_DIM) float32."""
    w1, b1, w2, b2, w3, b3 = packed_params
    B = x.shape[0]
    block_b, n_blocks = _choose_batch_tiling(B)
    Bp = block_b * n_blocks
    if Bp != B:                                  # pad batch only when needed
        x = jnp.pad(x, ((0, Bp - B), (0, 0)))

    flops = 2 * Bp * (OBS_DIM * H1P + H1P * H2P + H2P * ADP)
    bytes_accessed = (4 * (Bp * OBS_DIM + Bp * ADP + H1P + H2P + ADP)  # f32
                      + 2 * (OBS_DIM * H1P + H1P * H2P + H2P * ADP))   # bf16 W

    const = lambda i: (0, 0)        # weights/biases: same block every step
    out = pl.pallas_call(
        _actor_kernel,
        out_shape=jax.ShapeDtypeStruct((Bp, ADP), jnp.float32),
        grid_spec=pltpu.PrefetchScalarGridSpec(
            num_scalar_prefetch=0,
            grid=(n_blocks,),
            in_specs=[
                pl.BlockSpec((block_b, OBS_DIM), lambda i: (i, 0)),  # x tile
                pl.BlockSpec((OBS_DIM, H1P), const),                 # W1 bf16
                pl.BlockSpec((1, H1P), const),                       # b1 f32
                pl.BlockSpec((H1P, H2P), const),                     # W2 bf16
                pl.BlockSpec((1, H2P), const),                       # b2 f32
                pl.BlockSpec((H2P, ADP), const),                     # W3 bf16
                pl.BlockSpec((1, ADP), const),                       # b3 f32
            ],
            out_specs=pl.BlockSpec((block_b, ADP), lambda i: (i, 0)),
        ),
        compiler_params=pltpu.CompilerParams(
            dimension_semantics=("parallel",)),
        cost_estimate=pl.CostEstimate(
            flops=flops,
            transcendentals=Bp * ADP,
            bytes_accessed=bytes_accessed),
    )(x, w1, b1, w2, b2, w3, b3)

    # Strip lane padding and any batch padding.
    return out[:B, :ACTION_DIM]


def init_params(key):
    """PyTorch nn.Linear default init: U(-1/sqrt(fan_in), 1/sqrt(fan_in)) for
    both weight and bias.  Returned unpadded f32, weights stored (in, out)."""
    def linear(k, fan_in, fan_out):
        kw, kb = jax.random.split(k)
        bound = 1.0 / math.sqrt(fan_in)
        w = jax.random.uniform(kw, (fan_in, fan_out), jnp.float32,
                               minval=-bound, maxval=bound)
        b = jax.random.uniform(kb, (fan_out,), jnp.float32,
                               minval=-bound, maxval=bound)
        return w, b

    k1, k2, k3 = jax.random.split(key, 3)
    w1, b1 = linear(k1, OBS_DIM, H1)
    w2, b2 = linear(k2, H1, H2)
    w3, b3 = linear(k3, H2, ACTION_DIM)
    return (w1, b1, w2, b2, w3, b3)


def pack_params(params):
    """One-time parameter setup for the kernel: zero-pad hidden/output dims to
    MXU/lane-friendly multiples (400->512, 300->384, 8->128) and cast weights
    to bf16 (biases stay f32 for the f32 accumulate path)."""
    w1, b1, w2, b2, w3, b3 = params

    def pad_w(w, rows, cols):
        w = jnp.pad(w, ((0, rows - w.shape[0]), (0, cols - w.shape[1])))
        return w.astype(jnp.bfloat16)

    def pad_b(b, cols):
        return jnp.pad(b, (0, cols - b.shape[0])).reshape(1, cols)  # f32

    return (pad_w(w1, OBS_DIM, H1P), pad_b(b1, H1P),
            pad_w(w2, H1P, H2P),     pad_b(b2, H2P),
            pad_w(w3, H2P, ADP),     pad_b(b3, ADP))


def reference_forward(x, params):
    """Pure-f32 JAX reference matching the PyTorch module."""
    w1, b1, w2, b2, w3, b3 = params
    h = jnp.maximum(x @ w1 + b1, 0.0)
    h = jnp.maximum(h @ w2 + b2, 0.0)
    return jnp.tanh(h @ w3 + b3)


if __name__ == "__main__":
    key = jax.random.PRNGKey(0)
    pkey, xkey = jax.random.split(key)
    params = init_params(pkey)
    packed = pack_params(params)

    batch = 2
    x = jax.random.normal(xkey, (batch, OBS_DIM), jnp.float32)

    out = jax.block_until_ready(ddpg_actor_forward(x, packed))

    ref = reference_forward(x, params)
    assert out.shape == (batch, ACTION_DIM)
    # bf16 weights/activations at the dots -> relaxed tolerance vs f32 ref.
    max_err = jnp.max(jnp.abs(out - ref))
    assert jnp.allclose(out, ref, atol=3e-2, rtol=3e-2), \
        f"max abs err {max_err}"

    print("KERNEL_OK")
</pallas_src>

<mosaic_0001>
module attributes {stable_mosaic.version = 11 : i64} {
  func.func @_actor_kernel(%arg0: i32, %arg1: memref<8x16xf32, #tpu.memory_space<vmem>>, %arg2: memref<16x512xbf16, #tpu.memory_space<vmem>>, %arg3: memref<1x512xf32, #tpu.memory_space<vmem>>, %arg4: memref<512x384xbf16, #tpu.memory_space<vmem>>, %arg5: memref<1x384xf32, #tpu.memory_space<vmem>>, %arg6: memref<384x128xbf16, #tpu.memory_space<vmem>>, %arg7: memref<1x128xf32, #tpu.memory_space<vmem>>, %arg8: memref<8x128xf32, #tpu.memory_space<vmem>>) attributes {dimension_semantics = [#tpu.dimension_semantics<parallel>], iteration_bounds = array<i64: 1>, scalar_prefetch = 0 : i64, scratch_operands = 0 : i64, tpu.core_type = #tpu.core_type<tc>, window_params = [{transform_indices = @transform_0, window_bounds = array<i64: 8, 16>}, {pipeline_mode = #tpu.pipeline_mode<synchronous>, transform_indices = @transform_1, window_bounds = array<i64: 16, 512>}, {pipeline_mode = #tpu.pipeline_mode<synchronous>, transform_indices = @transform_2, window_bounds = array<i64: 1, 512>}, {pipeline_mode = #tpu.pipeline_mode<synchronous>, transform_indices = @transform_3, window_bounds = array<i64: 512, 384>}, {pipeline_mode = #tpu.pipeline_mode<synchronous>, transform_indices = @transform_4, window_bounds = array<i64: 1, 384>}, {pipeline_mode = #tpu.pipeline_mode<synchronous>, transform_indices = @transform_5, window_bounds = array<i64: 384, 128>}, {pipeline_mode = #tpu.pipeline_mode<synchronous>, transform_indices = @transform_6, window_bounds = array<i64: 1, 128>}, {transform_indices = @transform_7, window_bounds = array<i64: 8, 128>}]} {
    %c0 = arith.constant 0 : index
    %c0_0 = arith.constant 0 : index
    %0 = vector.load %arg1[%c0, %c0_0] : memref<8x16xf32, #tpu.memory_space<vmem>>, vector<8x16xf32>
    %1 = arith.truncf %0 : vector<8x16xf32> to vector<8x16xbf16>
    %c0_1 = arith.constant 0 : index
    %c0_2 = arith.constant 0 : index
    %2 = vector.load %arg2[%c0_1, %c0_2] : memref<16x512xbf16, #tpu.memory_space<vmem>>, vector<16x512xbf16>
    %cst = arith.constant dense<0.000000e+00> : vector<8x512xf32>
    %3 = tpu.matmul %1, %2, %cst {dimension_numbers = #tpu.dot_dimension_numbers<[1], [0], [0], [1], [0, 0, 1, 1], [], []>} : vector<8x16xbf16>, vector<16x512xbf16>, vector<8x512xf32> -> vector<8x512xf32>
    %c0_3 = arith.constant 0 : index
    %c0_4 = arith.constant 0 : index
    %4 = vector.load %arg3[%c0_3, %c0_4] : memref<1x512xf32, #tpu.memory_space<vmem>>, vector<1x512xf32>
    %5 = vector.broadcast %4 : vector<1x512xf32> to vector<8x512xf32>
    %6 = arith.addf %3, %5 : vector<8x512xf32>
    %cst_5 = arith.constant 0.000000e+00 : f32
    %7 = vector.broadcast %cst_5 : f32 to vector<8x512xf32>
    %8 = arith.maximumf %6, %7 : vector<8x512xf32>
    %9 = arith.truncf %8 : vector<8x512xf32> to vector<8x512xbf16>
    %c0_6 = arith.constant 0 : index
    %c0_7 = arith.constant 0 : index
    %10 = vector.load %arg4[%c0_6, %c0_7] : memref<512x384xbf16, #tpu.memory_space<vmem>>, vector<512x384xbf16>
    %cst_8 = arith.constant dense<0.000000e+00> : vector<8x384xf32>
    %11 = tpu.matmul %9, %10, %cst_8 {dimension_numbers = #tpu.dot_dimension_numbers<[1], [0], [0], [1], [0, 0, 1, 1], [], []>} : vector<8x512xbf16>, vector<512x384xbf16>, vector<8x384xf32> -> vector<8x384xf32>
    %c0_9 = arith.constant 0 : index
    %c0_10 = arith.constant 0 : index
    %12 = vector.load %arg5[%c0_9, %c0_10] : memref<1x384xf32, #tpu.memory_space<vmem>>, vector<1x384xf32>
    %13 = vector.broadcast %12 : vector<1x384xf32> to vector<8x384xf32>
    %14 = arith.addf %11, %13 : vector<8x384xf32>
    %cst_11 = arith.constant 0.000000e+00 : f32
    %15 = vector.broadcast %cst_11 : f32 to vector<8x384xf32>
    %16 = arith.maximumf %14, %15 : vector<8x384xf32>
    %17 = arith.truncf %16 : vector<8x384xf32> to vector<8x384xbf16>
    %c0_12 = arith.constant 0 : index
    %c0_13 = arith.constant 0 : index
    %18 = vector.load %arg6[%c0_12, %c0_13] : memref<384x128xbf16, #tpu.memory_space<vmem>>, vector<384x128xbf16>
    %cst_14 = arith.constant dense<0.000000e+00> : vector<8x128xf32>
    %19 = tpu.matmul %17, %18, %cst_14 {dimension_numbers = #tpu.dot_dimension_numbers<[1], [0], [0], [1], [0, 0, 1, 1], [], []>} : vector<8x384xbf16>, vector<384x128xbf16>, vector<8x128xf32> -> vector<8x128xf32>
    %c0_15 = arith.constant 0 : index
    %c0_16 = arith.constant 0 : index
    %20 = vector.load %arg7[%c0_15, %c0_16] : memref<1x128xf32, #tpu.memory_space<vmem>>, vector<1x128xf32>
    %21 = vector.broadcast %20 : vector<1x128xf32> to vector<8x128xf32>
    %22 = arith.addf %19, %21 : vector<8x128xf32>
    %23 = math.tanh %22 : vector<8x128xf32>
    %c0_17 = arith.constant 0 : index
    %c0_18 = arith.constant 0 : index
    %24 = vector.load %arg8[%c0_17, %c0_18] : memref<8x128xf32, #tpu.memory_space<vmem>>, vector<8x128xf32>
    tpu.vector_store %arg8[%c0_17, %c0_18], %23 {strides = array<i32>} : memref<8x128xf32, #tpu.memory_space<vmem>>, vector<8x128xf32>,
    return
  }
  func.func @transform_0(%arg0: i32) -> (i32, i32) {
    %c0_i32 = arith.constant 0 : i32
    %c0_i32_0 = arith.constant 0 : i32
    return %arg0, %c0_i32 : i32, i32
  }
  func.func @transform_1(%arg0: i32) -> (i32, i32) {
    %c0_i32 = arith.constant 0 : i32
    %c0_i32_0 = arith.constant 0 : i32
    %c0_i32_1 = arith.constant 0 : i32
    return %c0_i32, %c0_i32_0 : i32, i32
  }
  func.func @transform_2(%arg0: i32) -> (i32, i32) {
    %c0_i32 = arith.constant 0 : i32
    %c0_i32_0 = arith.constant 0 : i32
    %c0_i32_1 = arith.constant 0 : i32
    return %c0_i32, %c0_i32_0 : i32, i32
  }
  func.func @transform_3(%arg0: i32) -> (i32, i32) {
    %c0_i32 = arith.constant 0 : i32
    %c0_i32_0 = arith.constant 0 : i32
    %c0_i32_1 = arith.constant 0 : i32
    return %c0_i32, %c0_i32_0 : i32, i32
  }
  func.func @transform_4(%arg0: i32) -> (i32, i32) {
    %c0_i32 = arith.constant 0 : i32
    %c0_i32_0 = arith.constant 0 : i32
    %c0_i32_1 = arith.constant 0 : i32
    return %c0_i32, %c0_i32_0 : i32, i32
  }
  func.func @transform_5(%arg0: i32) -> (i32, i32) {
    %c0_i32 = arith.constant 0 : i32
    %c0_i32_0 = arith.constant 0 : i32
    %c0_i32_1 = arith.constant 0 : i32
    return %c0_i32, %c0_i32_0 : i32, i32
  }
  func.func @transform_6(%arg0: i32) -> (i32, i32) {
    %c0_i32 = arith.constant 0 : i32
    %c0_i32_0 = arith.constant 0 : i32
    %c0_i32_1 = arith.constant 0 : i32
    return %c0_i32, %c0_i32_0 : i32, i32
  }
  func.func @transform_7(%arg0: i32) -> (i32, i32) {
    %c0_i32 = arith.constant 0 : i32
    %c0_i32_0 = arith.constant 0 : i32
    return %arg0, %c0_i32 : i32, i32
  }
}

</mosaic_0001>

<bundles_post_ra>
// kernel: ddpg_actor_forward.1
= control target key start
LH: loop header
LB: loop body
LE: loop exit
PB: predicated region body
PF: predicated region fallthrough
CT: control target
= control target key end

     0   :  { %12 = vsyncpa [#allocation3], 0  ;;  %s2048_s0 = inlined_call_operand.vmem [shape: f32[8,16], index: 0, kind: input, shape index: {}]   ;;  %s2049_s1 = inlined_call_operand.hbm [shape: bf16[16,512], index: 1, kind: input, shape index: {}]   ;;  %s2050_s2 = inlined_call_operand.vmem [shape: f32[1,512], index: 2, kind: input, shape index: {}]   ;;  %s2051_s3 = inlined_call_operand.hbm [shape: bf16[512,384], index: 3, kind: input, shape index: {}]   ;;  %s2052_s4 = inlined_call_operand.vmem [shape: f32[1,384], index: 4, kind: input, shape index: {}]   ;;  %s2053_s5 = inlined_call_operand.hbm [shape: bf16[384,128], index: 5, kind: input, shape index: {}]   ;;  %s2054_s6 = inlined_call_operand.vmem [shape: f32[1,128], index: 6, kind: input, shape index: {}]   ;;  %s2055_s7 = inlined_call_operand.vmem [shape: f32[8,128], index: 7, kind: output, shape index: {}]  }
   0x1   :  { %13 = vsyncpa [#allocation5], 0  ;;  %s35_s26 = sshll.u32 %s2051_s3, 4  ;;  %s1939_s27 = smov [#allocation4]   ;;  %s36_s26 = int_to_ptr.hbm [resolvable:$true] %s35_s26 }
   0x2   :  { %s37_s28 = sshll.u32 %s1939_s27, 4  ;;  %s20_s8 = sshll.u32 %s2049_s1, 4  ;;  %s38_s28 = int_to_ptr.vmem [resolvable:$true] %s37_s28  ;;  %s21_s8 = int_to_ptr.hbm [resolvable:$true] %s20_s8 }
   0x3   :  { %s1940_s9 = smov 192   ;;  %s1941_s10 = smov 12  }
   0x4   :  { %43 = dma.hbm_to_vmem [thread:$0]  %s36_s26, 12288, %s38_s28, [#allocation5], %s1940_s9, %s1940_s9, %s1941_s10  }
   0x5   :  { %s1942_s11 = smov [#allocation2]   ;;  %s1943_s13 = smov 256  }
   0x6   :  { %s22_s12 = sshll.u32 %s1942_s11, 4  ;;  %s1944_s14 = smov 16   ;;  %s23_s12 = int_to_ptr.vmem [resolvable:$true] %s22_s12 }
   0x7   :  { %28 = dma.hbm_to_vmem [thread:$0]  %s21_s8, 512, %s23_s12, [#allocation3], %s1943_s13, %s1943_s13, %s1944_s14  }
   0x8   :  { %s50_s16 = sshll.u32 %s2053_s5, 4  ;;  %s1945_s17 = smov [#allocation6]   ;;  %s51_s16 = int_to_ptr.hbm [resolvable:$true] %s50_s16 }
   0x9   :  { %s52_s18 = sshll.u32 %s1945_s17, 4  ;;  %s1946_s19 = smov 64   ;;  %s53_s18 = int_to_ptr.vmem [resolvable:$true] %s52_s18 }
   0xa   :  { %s1947_s1 = smov 4  }
   0xb   :  { %58 = dma.hbm_to_vmem [thread:$0]  %s51_s16, 3072, %s53_s18, [#allocation5], %s1946_s19, %s1946_s19, %s1947_s1  }
   0xc   :  { %1935 = dma.done.wait [#allocation3], 512  }
   0xd   :  { %1936 = vsyncadd [#allocation3], 4294966784 }
   0xe   :  { %1937 = dma.done.wait [#allocation5], 15360  }
   0xf   :  { %1938 = vsyncadd [#allocation5], 4294951936  ;;  %v1229_v0 = vld [vmem:[#allocation2] sm:$0xf]  ;;  %v1729_v1 = vld [vmem:[#allocation2 + $0xc] sm:$0xf0] }
  0x10   :  { %v1727_v2 = vld [vmem:[#allocation2 + $0x4] sm:$0xf]  ;;  %v1230_v3 = vor.u32 %v1729_v1, %v1229_v0  ;;  %v1231_v4 = vld [vmem:[#allocation2 + $0x10] sm:$0xf0]  ;;  %v1237_v5 = vld [vmem:[#allocation2 + $0x8] sm:$0xf] }
  0x11   :  { %v1730_v6 = vld [vmem:[#allocation2 + $0x14] sm:$0xf0]  ;;  %v1234_v7 = vor.u32 %v1727_v2, %v1231_v4  ;;  %v74_v9 = vld [vmem:[%s2048_s0] sm:$0xff]  ;;  %vm110_vm0 = vcmask 130048   ;;  %v1728_v10 = vld [vmem:[#allocation2 + $0xc] sm:$0xf] }
  0x12   :  { %v1238_v8 = vor.u32 %v1730_v6, %v1237_v5  ;;  %v1239_v11 = vld [vmem:[#allocation2 + $0x18] sm:$0xf0]  ;;  %121 = vmatpush.bf16.msra.mxu3 %v1230_v3  ;;  %v2000_v12 = vpack.c.bf16 %v74_v9, %v74_v9  ;;  %v1429_v14 = vld [vmem:[#allocation4 + $0x168] sm:$0xf]  ;;  %v1777_v15 = vld [vmem:[#allocation4 + $0x170] sm:$0xf0] }
  0x13   :  { %v1242_v13 = vor.u32 %v1728_v10, %v1239_v11  ;;  %v1417_v16 = vld [vmem:[#allocation4 + $0x150] sm:$0xf]  ;;  %134 = vmatpush.bf16.msra.mxu1 %v1234_v7  ;;  %v1430_v17 = vor.u32 %v1777_v15, %v1429_v14  ;;  %v1774_v18 = vld [vmem:[#allocation4 + $0x158] sm:$0xf0]  ;;  %v1333_v19 = vld [vmem:[#allocation4 + $0xa8] sm:$0xf] }
  0x14   :  { %147 = vmatpush.bf16.msra.mxu2 %v1238_v8  ;;  %v1753_v20 = vld [vmem:[#allocation4 + $0xb0] sm:$0xf0]  ;;  %v1525_v22 = vld [vmem:[#allocation4 + $0x228] sm:$0xf]  ;;  %v1418_v24 = vor.u32 %v1774_v18, %v1417_v16  ;;  %v1405_v26 = vld [vmem:[#allocation4 + $0x138] sm:$0xf] }
  0x15   :  { %v1334_v21 = vor.u32 %v1753_v20, %v1333_v19  ;;  %v1801_v23 = vld [vmem:[#allocation4 + $0x230] sm:$0xf0]  ;;  %1243 = vmatmul.msk.bf16.vlgmr.msra.gmra.mxu3 %vm110_vm0, %v2000_v12  ;;  %v1321_v27 = vld [vmem:[#allocation4 + $0x90] sm:$0xf]  ;;  %v1750_v28 = vld [vmem:[#allocation4 + $0x98] sm:$0xf0] }
  0x16   :  { %160 = vmatpush.bf16.msrb.mxu3 %v1242_v13  ;;  %v1526_v25 = vor.u32 %v1801_v23, %v1525_v22  ;;  %1244 = vmatmul.msk.bf16.vlgmr.msra.gmra.mxu1 %vm110_vm0, %v2000_v12  ;;  %v1771_v29 = vld [vmem:[#allocation4 + $0x140] sm:$0xf0]  ;;  %v1513_v30 = vld [vmem:[#allocation4 + $0x210] sm:$0xf]  ;;  %v1798_v31 = vld [vmem:[#allocation4 + $0x218] sm:$0xf0]  ;;  %v1322_v32 = vor.u32 %v1750_v28, %v1321_v27 }
  0x17   :  { %835 = vmatpush.bf16.msrb.mxu1 %v1430_v17  ;;  %1245 = vmatmul.msk.bf16.vlgmr.msra.gmra.mxu2 %vm110_vm0, %v2000_v12  ;;  %v1514_v33 = vor.u32 %v1798_v31, %v1513_v30  ;;  %v1309_v34 = vld [vmem:[#allocation4 + $0x78] sm:$0xf]  ;;  %v1747_v35 = vld [vmem:[#allocation4 + $0x80] sm:$0xf0]  ;;  %v1406_v38 = vor.u32 %v1771_v29, %v1405_v26  ;;  %v1393_v39 = vld [vmem:[#allocation4 + $0x120] sm:$0xf] }
  0x18   :  { %822 = vmatpush.bf16.msra.mxu0 %v1334_v21  ;;  %848 = vmatpush.bf16.msrb.mxu2 %v1526_v25  ;;  %v1501_v36 = vld [vmem:[#allocation4 + $0x1f8] sm:$0xf]  ;;  %v1795_v37 = vld [vmem:[#allocation4 + $0x200] sm:$0xf0]  ;;  %v1768_v40 = vld [vmem:[#allocation4 + $0x128] sm:$0xf0]  ;;  %v1310_v41 = vor.u32 %v1747_v35, %v1309_v34 }
  0x19   :  { %v1502_v42 = vor.u32 %v1795_v37, %v1501_v36  ;;  %v1297_v43 = vld [vmem:[#allocation4 + $0x60] sm:$0xf]  ;;  %v1744_v44 = vld [vmem:[#allocation4 + $0x68] sm:$0xf0]  ;;  %v1621_v47 = vld [vmem:[#allocation4 + $0x2e8] sm:$0xf]  ;;  %v1394_v48 = vor.u32 %v1768_v40, %v1393_v39 }
  0x1a   :  { %v1489_v45 = vld [vmem:[#allocation4 + $0x1e0] sm:$0xf]  ;;  %v1792_v46 = vld [vmem:[#allocation4 + $0x1e8] sm:$0xf0]  ;;  %v1825_v49 = vld [vmem:[#allocation4 + $0x2f0] sm:$0xf0]  ;;  %v1298_v53 = vor.u32 %v1744_v44, %v1297_v43 }
  0x1b   :  { %836 = vmatpush.bf16.msrb.mxu1 %v1418_v24  ;;  %v1381_v50 = vld [vmem:[#allocation4 + $0x108] sm:$0xf]  ;;  %v1765_v51 = vld [vmem:[#allocation4 + $0x110] sm:$0xf0]  ;;  %v1622_v52 = vor.u32 %v1825_v49, %v1621_v47  ;;  %v1490_v54 = vor.u32 %v1792_v46, %v1489_v45  ;;  %v1609_v56 = vld [vmem:[#allocation4 + $0x2d0] sm:$0xf] }
  0x1c   :  { %823 = vmatpush.bf16.msra.mxu0 %v1322_v32  ;;  %849 = vmatpush.bf16.msrb.mxu2 %v1514_v33  ;;  %v1285_v55 = vld [vmem:[#allocation4 + $0x48] sm:$0xf]  ;;  %v1822_v57 = vld [vmem:[#allocation4 + $0x2d8] sm:$0xf0]  ;;  %v1741_v58 = vld [vmem:[#allocation4 + $0x50] sm:$0xf0]  ;;  %v1382_v62 = vor.u32 %v1765_v51, %v1381_v50 }
  0x1d   :  { %v1477_v59 = vld [vmem:[#allocation4 + $0x1c8] sm:$0xf]  ;;  %v1789_v60 = vld [vmem:[#allocation4 + $0x1d0] sm:$0xf0]  ;;  %861 = vmatpush.bf16.msra.mxu3 %v1622_v52  ;;  %v1610_v61 = vor.u32 %v1822_v57, %v1609_v56  ;;  %v1369_v63 = vld [vmem:[#allocation4 + $0xf0] sm:$0xf]  ;;  %v1286_v2 = vor.u32 %v1741_v58, %v1285_v55 }
  0x1e   :  { %v1762_v0 = vld [vmem:[#allocation4 + $0xf8] sm:$0xf0]  ;;  %v1597_v1 = vld [vmem:[#allocation4 + $0x2b8] sm:$0xf]  ;;  %v1478_v3 = vor.u32 %v1789_v60, %v1477_v59  ;;  %v1273_v4 = vld [vmem:[#allocation4 + $0x30] sm:$0xf] }
  0x1f   :  { %837 = vmatpush.bf16.msrb.mxu1 %v1406_v38  ;;  %v1819_v5 = vld [vmem:[#allocation4 + $0x2c0] sm:$0xf0]  ;;  %v1738_v6 = vld [vmem:[#allocation4 + $0x38] sm:$0xf0]  ;;  %v1465_v7 = vld [vmem:[#allocation4 + $0x1b0] sm:$0xf]  ;;  %v1370_v10 = vor.u32 %v1762_v0, %v1369_v63 }
  0x20   :  { %824 = vmatpush.bf16.msra.mxu0 %v1310_v41  ;;  %850 = vmatpush.bf16.msrb.mxu2 %v1502_v42  ;;  %v1786_v8 = vld [vmem:[#allocation4 + $0x1b8] sm:$0xf0]  ;;  %v1598_v9 = vor.u32 %v1819_v5, %v1597_v1  ;;  %v1585_v11 = vld [vmem:[#allocation4 + $0x2a0] sm:$0xf]  ;;  %v1816_v13 = vld [vmem:[#allocation4 + $0x2a8] sm:$0xf0]  ;;  %v1274_v16 = vor.u32 %v1738_v6, %v1273_v4 }
  0x21   :  { %862 = vmatpush.bf16.msra.mxu3 %v1610_v61  ;;  %v1357_v14 = vld [vmem:[#allocation4 + $0xd8] sm:$0xf]  ;;  %v1759_v15 = vld [vmem:[#allocation4 + $0xe0] sm:$0xf0]  ;;  %v1466_v17 = vor.u32 %v1786_v8, %v1465_v7  ;;  %v1586_v22 = vor.u32 %v1816_v13, %v1585_v11  ;;  %v1573_v24 = vld [vmem:[#allocation4 + $0x288] sm:$0xf] }
  0x22   :  { %v1261_v18 = vld [vmem:[#allocation4 + $0x18] sm:$0xf]  ;;  %v1735_v19 = vld [vmem:[#allocation4 + $0x20] sm:$0xf0]  ;;  %v1358_v23 = vor.u32 %v1759_v15, %v1357_v14  ;;  %v1345_v25 = vld [vmem:[#allocation4 + $0xc0] sm:$0xf] }
  0x23   :  { %838 = vmatpush.bf16.msrb.mxu1 %v1394_v48  ;;  %v1453_v20 = vld [vmem:[#allocation4 + $0x198] sm:$0xf]  ;;  %v1783_v21 = vld [vmem:[#allocation4 + $0x1a0] sm:$0xf0]  ;;  %v1756_v26 = vld [vmem:[#allocation4 + $0xc8] sm:$0xf0]  ;;  %v1262_v29 = vor.u32 %v1735_v19, %v1261_v18 }
  0x24   :  { %825 = vmatpush.bf16.msra.mxu0 %v1298_v53  ;;  %851 = vmatpush.bf16.msrb.mxu2 %v1490_v54  ;;  %v1776_v27 = vld [vmem:[#allocation4 + $0x16c] sm:$0xf]  ;;  %v1431_v28 = vld [vmem:[#allocation4 + $0x174] sm:$0xf0]  ;;  %v1454_v30 = vor.u32 %v1783_v21, %v1453_v20  ;;  %v1249_v31 = vld [vmem:[#allocation4] sm:$0xf]  ;;  %v1346_v37 = vor.u32 %v1756_v26, %v1345_v25 }
  0x25   :  { %1246 = vmatmul.msk.bf16.vlgmr.msrb.gmra.mxu3 %vm110_vm0, %v2000_v12  ;;  %v1813_v12 = vld [vmem:[#allocation4 + $0x290] sm:$0xf0]  ;;  %v1732_v32 = vld [vmem:[#allocation4 + $0x8] sm:$0xf0]  ;;  %v1441_v33 = vld [vmem:[#allocation4 + $0x180] sm:$0xf]  ;;  %v1434_v41 = vor.u32 %v1776_v27, %v1431_v28 }
  0x26   :  { %863 = vmatpush.bf16.msra.mxu3 %v1598_v9  ;;  %v1780_v34 = vld [vmem:[#allocation4 + $0x188] sm:$0xf0]  ;;  %v1574_v36 = vor.u32 %v1813_v12, %v1573_v24  ;;  %v1335_v38 = vld [vmem:[#allocation4 + $0xb4] sm:$0xf0]  ;;  %v1561_v42 = vld [vmem:[#allocation4 + $0x270] sm:$0xf]  ;;  %v1250_v46 = vor.u32 %v1732_v32, %v1249_v31 }
  0x27   :  { %839 = vmatpush.bf16.msrb.mxu1 %v1382_v62  ;;  %v1752_v35 = vld [vmem:[#allocation4 + $0xac] sm:$0xf]  ;;  %v1527_v40 = vld [vmem:[#allocation4 + $0x234] sm:$0xf0]  ;;  %v1810_v43 = vld [vmem:[#allocation4 + $0x278] sm:$0xf0]  ;;  %v1442_v47 = vor.u32 %v1780_v34, %v1441_v33 }
  0x28   :  { %826 = vmatpush.bf16.msra.mxu0 %v1286_v2  ;;  %852 = vmatpush.bf16.msrb.mxu2 %v1478_v3  ;;  %v1800_v39 = vld [vmem:[#allocation4 + $0x22c] sm:$0xf]  ;;  %v1773_v44 = vld [vmem:[#allocation4 + $0x154] sm:$0xf]  ;;  %v1419_v45 = vld [vmem:[#allocation4 + $0x15c] sm:$0xf0]  ;;  %v1338_v48 = vor.u32 %v1752_v35, %v1335_v38  ;;  %v1562_v54 = vor.u32 %v1810_v43, %v1561_v42 }
  0x29   :  { %v1530_v49 = vor.u32 %v1800_v39, %v1527_v40  ;;  %v1749_v50 = vld [vmem:[#allocation4 + $0x94] sm:$0xf]  ;;  %v1323_v51 = vld [vmem:[#allocation4 + $0x9c] sm:$0xf0]  ;;  %v1422_v55 = vor.u32 %v1773_v44, %v1419_v45  ;;  %v1549_v56 = vld [vmem:[#allocation4 + $0x258] sm:$0xf] }
  0x2a   :  { %864 = vmatpush.bf16.msra.mxu3 %v1586_v22  ;;  %v1797_v52 = vld [vmem:[#allocation4 + $0x214] sm:$0xf]  ;;  %v1515_v53 = vld [vmem:[#allocation4 + $0x21c] sm:$0xf0]  ;;  %v1807_v57 = vld [vmem:[#allocation4 + $0x260] sm:$0xf0]  ;;  %v1326_v60 = vor.u32 %v1749_v50, %v1323_v51 }
  0x2b   :  { %840 = vmatpush.bf16.msrb.mxu1 %v1370_v10  ;;  %v1770_v58 = vld [vmem:[#allocation4 + $0x13c] sm:$0xf]  ;;  %v1407_v59 = vld [vmem:[#allocation4 + $0x144] sm:$0xf0]  ;;  %v1518_v61 = vor.u32 %v1797_v52, %v1515_v53  ;;  %v1550_v2 = vor.u32 %v1807_v57, %v1549_v56  ;;  %v1767_v4 = vld [vmem:[#allocation4 + $0x124] sm:$0xf] }
  0x2c   :  { %827 = vmatpush.bf16.msra.mxu0 %v1274_v16  ;;  %853 = vmatpush.bf16.msrb.mxu2 %v1466_v17  ;;  %v1746_v62 = vld [vmem:[#allocation4 + $0x7c] sm:$0xf]  ;;  %v1311_v63 = vld [vmem:[#allocation4 + $0x84] sm:$0xf0]  ;;  %v1410_v3 = vor.u32 %v1770_v58, %v1407_v59  ;;  %v1395_v5 = vld [vmem:[#allocation4 + $0x12c] sm:$0xf0] }
  0x2d   :  { %v1794_v0 = vld [vmem:[#allocation4 + $0x1fc] sm:$0xf]  ;;  %v1503_v1 = vld [vmem:[#allocation4 + $0x204] sm:$0xf0]  ;;  %v1314_v6 = vor.u32 %v1746_v62, %v1311_v63  ;;  %v1743_v8 = vld [vmem:[#allocation4 + $0x64] sm:$0xf]  ;;  %v1398_v13 = vor.u32 %v1767_v4, %v1395_v5 }
  0x2e   :  { %865 = vmatpush.bf16.msra.mxu3 %v1574_v36  ;;  %v1506_v7 = vor.u32 %v1794_v0, %v1503_v1  ;;  %v1299_v9 = vld [vmem:[#allocation4 + $0x6c] sm:$0xf0]  ;;  %v1791_v10 = vld [vmem:[#allocation4 + $0x1e4] sm:$0xf]  ;;  %v1764_v14 = vld [vmem:[#allocation4 + $0x10c] sm:$0xf] }
  0x2f   :  { %841 = vmatpush.bf16.msrb.mxu1 %v1358_v23  ;;  %v1491_v11 = vld [vmem:[#allocation4 + $0x1ec] sm:$0xf0]  ;;  %v1383_v15 = vld [vmem:[#allocation4 + $0x114] sm:$0xf0]  ;;  %v1302_v16 = vor.u32 %v1743_v8, %v1299_v9  ;;  %v1761_v19 = vld [vmem:[#allocation4 + $0xf4] sm:$0xf] }
  0x30   :  { %828 = vmatpush.bf16.msra.mxu0 %v1262_v29  ;;  %854 = vmatpush.bf16.msrb.mxu2 %v1454_v30  ;;  %v1494_v17 = vor.u32 %v1791_v10, %v1491_v11  ;;  %v1386_v18 = vor.u32 %v1764_v14, %v1383_v15  ;;  %v1371_v20 = vld [vmem:[#allocation4 + $0xfc] sm:$0xf0]  ;;  %v1804_v23 = vld [vmem:[#allocation4 + $0x248] sm:$0xf0]  ;;  %v1287_v25 = vld [vmem:[#allocation4 + $0x54] sm:$0xf0] }
  0x31   :  { %v1374_v21 = vor.u32 %v1761_v19, %v1371_v20  ;;  %v1537_v22 = vld [vmem:[#allocation4 + $0x240] sm:$0xf]  ;;  %v1740_v12 = vld [vmem:[#allocation4 + $0x4c] sm:$0xf]  ;;  %v1479_v28 = vld [vmem:[#allocation4 + $0x1d4] sm:$0xf0] }
  0x32   :  { %866 = vmatpush.bf16.msra.mxu3 %v1562_v54  ;;  %v1538_v24 = vor.u32 %v1804_v23, %v1537_v22  ;;  %v1788_v26 = vld [vmem:[#allocation4 + $0x1cc] sm:$0xf]  ;;  %v1290_v27 = vor.u32 %v1740_v12, %v1287_v25  ;;  %v1623_v30 = vld [vmem:[#allocation4 + $0x2f4] sm:$0xf0]  ;;  %v1758_v33 = vld [vmem:[#allocation4 + $0xdc] sm:$0xf] }
  0x33   :  { %842 = vmatpush.bf16.msrb.mxu1 %v1346_v37  ;;  %v1824_v29 = vld [vmem:[#allocation4 + $0x2ec] sm:$0xf]  ;;  %v1482_v31 = vor.u32 %v1788_v26, %v1479_v28  ;;  %v1359_v34 = vld [vmem:[#allocation4 + $0xe4] sm:$0xf0]  ;;  %v1737_v36 = vld [vmem:[#allocation4 + $0x34] sm:$0xf] }
  0x34   :  { %829 = vmatpush.bf16.msra.mxu0 %v1250_v46  ;;  %855 = vmatpush.bf16.msrb.mxu2 %v1442_v47  ;;  %v1626_v32 = vor.u32 %v1824_v29, %v1623_v30  ;;  %v1362_v35 = vor.u32 %v1758_v33, %v1359_v34  ;;  %v1275_v37 = vld [vmem:[#allocation4 + $0x3c] sm:$0xf0]  ;;  %v1785_v38 = vld [vmem:[#allocation4 + $0x1b4] sm:$0xf]  ;;  %v1755_v45 = vld [vmem:[#allocation4 + $0xc4] sm:$0xf] }
  0x35   :  { %v1278_v39 = vor.u32 %v1737_v36, %v1275_v37  ;;  %v1467_v40 = vld [vmem:[#allocation4 + $0x1bc] sm:$0xf0]  ;;  %v1347_v46 = vld [vmem:[#allocation4 + $0xcc] sm:$0xf0]  ;;  %v1782_v50 = vld [vmem:[#allocation4 + $0x19c] sm:$0xf] }
  0x36   :  { %867 = vmatpush.bf16.msra.mxu3 %v1550_v2  ;;  %v1611_v42 = vld [vmem:[#allocation4 + $0x2dc] sm:$0xf0]  ;;  %v1470_v43 = vor.u32 %v1785_v38, %v1467_v40  ;;  %v1350_v47 = vor.u32 %v1755_v45, %v1347_v46  ;;  %v1455_v52 = vld [vmem:[#allocation4 + $0x1a4] sm:$0xf0]  ;;  %v1818_v53 = vld [vmem:[#allocation4 + $0x2bc] sm:$0xf] }
  0x37   :  { %887 = vmatpush.bf16.msra.mxu1 %v1434_v41  ;;  %v1821_v41 = vld [vmem:[#allocation4 + $0x2d4] sm:$0xf]  ;;  %v1599_v54 = vld [vmem:[#allocation4 + $0x2c4] sm:$0xf0]  ;;  %v1731_v57 = vld [vmem:[#allocation4 + $0x4] sm:$0xf] }
  0x38   :  { %874 = vmatpush.bf16.msrb.mxu0 %v1338_v48  ;;  %900 = vmatpush.bf16.msra.mxu2 %v1530_v49  ;;  %v1614_v44 = vor.u32 %v1821_v41, %v1611_v42  ;;  %v1734_v48 = vld [vmem:[#allocation4 + $0x1c] sm:$0xf]  ;;  %v1263_v49 = vld [vmem:[#allocation4 + $0x24] sm:$0xf0]  ;;  %v1602_v56 = vor.u32 %v1818_v53, %v1599_v54  ;;  %v1251_v58 = vld [vmem:[#allocation4 + $0xc] sm:$0xf0] }
  0x39   :  { %v1266_v51 = vor.u32 %v1734_v48, %v1263_v49  ;;  %v1779_v59 = vld [vmem:[#allocation4 + $0x184] sm:$0xf]  ;;  %v1587_v63 = vld [vmem:[#allocation4 + $0x2ac] sm:$0xf0]  ;;  %v1812_v2 = vld [vmem:[#allocation4 + $0x28c] sm:$0xf] }
  0x3a   :  { %868 = vmatpush.bf16.msra.mxu3 %v1538_v24  ;;  %v1815_v62 = vld [vmem:[#allocation4 + $0x2a4] sm:$0xf]  ;;  %v1809_v5 = vld [vmem:[#allocation4 + $0x274] sm:$0xf]  ;;  %v1806_v8 = vld [vmem:[#allocation4 + $0x25c] sm:$0xf] }
  0x3b   :  { %888 = vmatpush.bf16.msra.mxu1 %v1422_v55  ;;  %v1458_v55 = vor.u32 %v1782_v50, %v1455_v52  ;;  %v1590_v1 = vor.u32 %v1815_v62, %v1587_v63  ;;  %v1551_v9 = vld [vmem:[#allocation4 + $0x264] sm:$0xf0]  ;;  %v2013_v11 = vld [vmem:[%s2050_s2] sm:$0xf]  ;;  %v1539_v14 = vld [vmem:[#allocation4 + $0x24c] sm:$0xf0] }
  0x3c   :  { %875 = vmatpush.bf16.msrb.mxu0 %v1326_v60  ;;  %901 = vmatpush.bf16.msra.mxu2 %v1518_v61  ;;  %v1254_v60 = vor.u32 %v1731_v57, %v1251_v58  ;;  %v1443_v61 = vld [vmem:[#allocation4 + $0x18c] sm:$0xf0]  ;;  %v1554_v10 = vor.u32 %v1806_v8, %v1551_v9  ;;  %v1778_v20 = vld [vmem:[#allocation4 + $0x178] sm:$0xf0]  ;;  %v84_v23 = vperm.slane %v2013_v11, 2 }
  0x3d   :  { %v1446_v0 = vor.u32 %v1779_v59, %v1443_v61  ;;  %v1437_v19 = vld [vmem:[#allocation4 + $0x170] sm:$0xf]  ;;  %v1425_v26 = vld [vmem:[#allocation4 + $0x158] sm:$0xf]  ;;  %v1802_v34 = vld [vmem:[#allocation4 + $0x238] sm:$0xf0] }
  0x3e   :  { %913 = vmatpush.bf16.msrb.mxu3 %v1626_v32  ;;  %v1438_v24 = vor.u32 %v1778_v20, %v1437_v19  ;;  %v1341_v30 = vld [vmem:[#allocation4 + $0xb0] sm:$0xf]  ;;  %v1413_v40 = vld [vmem:[#allocation4 + $0x140] sm:$0xf]  ;;  %v1772_v41 = vld [vmem:[#allocation4 + $0x148] sm:$0xf0] }
  0x3f   :  { %889 = vmatpush.bf16.msra.mxu1 %v1410_v3  ;;  %v1575_v3 = vld [vmem:[#allocation4 + $0x294] sm:$0xf0]  ;;  %v1533_v33 = vld [vmem:[#allocation4 + $0x230] sm:$0xf]  ;;  %v1751_v45 = vld [vmem:[#allocation4 + $0xa0] sm:$0xf0]  ;;  %v1414_v49 = vor.u32 %v1772_v41, %v1413_v40 }
  0x40   :  { %876 = vmatpush.bf16.msrb.mxu0 %v1314_v6  ;;  %902 = vmatpush.bf16.msra.mxu2 %v1506_v7  ;;  %v1578_v4 = vor.u32 %v1812_v2, %v1575_v3  ;;  %v1563_v6 = vld [vmem:[#allocation4 + $0x27c] sm:$0xf0]  ;;  %v1799_v48 = vld [vmem:[#allocation4 + $0x220] sm:$0xf0]  ;;  %v1401_v52 = vld [vmem:[#allocation4 + $0x128] sm:$0xf] }
  0x41   :  { %v1566_v7 = vor.u32 %v1809_v5, %v1563_v6  ;;  %v1769_v53 = vld [vmem:[#allocation4 + $0x130] sm:$0xf0]  ;;  %v1748_v57 = vld [vmem:[#allocation4 + $0x88] sm:$0xf0]  ;;  %v1509_v58 = vld [vmem:[#allocation4 + $0x200] sm:$0xf] }
  0x42   :  { %914 = vmatpush.bf16.msrb.mxu3 %v1614_v44  ;;  %v1329_v44 = vld [vmem:[#allocation4 + $0x98] sm:$0xf]  ;;  %v1796_v59 = vld [vmem:[#allocation4 + $0x208] sm:$0xf0]  ;;  %v1389_v62 = vld [vmem:[#allocation4 + $0x110] sm:$0xf] }
  0x43   :  { %890 = vmatpush.bf16.msra.mxu1 %v1398_v13  ;;  %v1803_v13 = vld [vmem:[#allocation4 + $0x244] sm:$0xf]  ;;  %v1766_v63 = vld [vmem:[#allocation4 + $0x118] sm:$0xf0]  ;;  %v1305_v2 = vld [vmem:[#allocation4 + $0x68] sm:$0xf] }
  0x44   :  { %877 = vmatpush.bf16.msrb.mxu0 %v1302_v16  ;;  %903 = vmatpush.bf16.msra.mxu2 %v1494_v17  ;;  %v1542_v15 = vor.u32 %v1803_v13, %v1539_v14  ;;  %v83_v16 = vperm.slane %v2013_v11, 1  ;;  %v1745_v3 = vld [vmem:[#allocation4 + $0x70] sm:$0xf0]  ;;  %v1390_v6 = vor.u32 %v1766_v63, %v1389_v62  ;;  %v1377_v9 = vld [vmem:[#allocation4 + $0xf8] sm:$0xf] }
  0x45   :  { %v1793_v5 = vld [vmem:[#allocation4 + $0x1f0] sm:$0xf0]  ;;  %v1306_v8 = vor.u32 %v1745_v3, %v1305_v2  ;;  %v1629_v20 = vld [vmem:[#allocation4 + $0x2f0] sm:$0xf]  ;;  %v1269_v40 = vld [vmem:[#allocation4 + $0x20] sm:$0xf] }
  0x46   :  { %915 = vmatpush.bf16.msrb.mxu3 %v1602_v56  ;;  %v1317_v56 = vld [vmem:[#allocation4 + $0x80] sm:$0xf]  ;;  %v1581_v62 = vld [vmem:[#allocation4 + $0x290] sm:$0xf]  ;;  %v1814_v63 = vld [vmem:[#allocation4 + $0x298] sm:$0xf0] }
  0x47   :  { %891 = vmatpush.bf16.msra.mxu1 %v1386_v18  ;;  %v1318_v61 = vor.u32 %v1748_v57, %v1317_v56  ;;  %v1781_v56 = vld [vmem:[#allocation4 + $0x190] sm:$0xf0]  ;;  %v1593_v57 = vld [vmem:[#allocation4 + $0x2a8] sm:$0xf]  ;;  %v1811_v2 = vld [vmem:[#allocation4 + $0x280] sm:$0xf0] }
  0x48   :  { %878 = vmatpush.bf16.msrb.mxu0 %v1290_v27  ;;  %904 = vmatpush.bf16.msra.mxu2 %v1482_v31  ;;  %v1775_v27 = vld [vmem:[#allocation4 + $0x160] sm:$0xf0]  ;;  %v1754_v31 = vld [vmem:[#allocation4 + $0xb8] sm:$0xf0] }
  0x49   :  { %v1426_v36 = vor.u32 %v1775_v27, %v1425_v26  ;;  %v1281_v27 = vld [vmem:[#allocation4 + $0x38] sm:$0xf] }
  0x4a   :  { %916 = vmatpush.bf16.msrb.mxu3 %v1590_v1  ;;  %v1510_v1 = vor.u32 %v1796_v59, %v1509_v58  ;;  %v1817_v58 = vld [vmem:[#allocation4 + $0x2b0] sm:$0xf0] }
  0x4b   :  { %892 = vmatpush.bf16.msra.mxu1 %v1374_v21  ;;  %v82_v21 = vperm.slane %v2013_v11, 0 }
  0x4c   :  { %879 = vmatpush.bf16.msrb.mxu0 %v1278_v39  ;;  %905 = vmatpush.bf16.msra.mxu2 %v1470_v43  ;;  %v1342_v39 = vor.u32 %v1754_v31, %v1341_v30  ;;  %v1534_v43 = vor.u32 %v1802_v34, %v1533_v33  ;;  %v1473_v30 = vld [vmem:[#allocation4 + $0x1b8] sm:$0xf]  ;;  %v1787_v31 = vld [vmem:[#allocation4 + $0x1c0] sm:$0xf0] }
  0x4d   :  { %v1617_v33 = vld [vmem:[#allocation4 + $0x2d8] sm:$0xf]  ;;  %v1823_v34 = vld [vmem:[#allocation4 + $0x2e0] sm:$0xf0] }
  0x4e   :  { %917 = vmatpush.bf16.msrb.mxu3 %v1578_v4  ;;  %v1497_v4 = vld [vmem:[#allocation4 + $0x1e8] sm:$0xf]  ;;  %v1618_v41 = vor.u32 %v1823_v34, %v1617_v33  ;;  %v1847_v33 = vld [vmem:[#allocation6 + $0xa0] sm:$0xff] }
  0x4f   :  { %893 = vmatpush.bf16.msra.mxu1 %v1362_v35  ;;  %v1498_v14 = vor.u32 %v1793_v5, %v1497_v4  ;;  %v1557_v4 = vld [vmem:[#allocation4 + $0x260] sm:$0xf]  ;;  %v1808_v5 = vld [vmem:[#allocation4 + $0x268] sm:$0xf0] }
  0x50   :  { %880 = vmatpush.bf16.msrb.mxu0 %v1266_v51  ;;  %906 = vmatpush.bf16.msra.mxu2 %v1458_v55  ;;  %v1330_v51 = vor.u32 %v1751_v45, %v1329_v44  ;;  %v1461_v44 = vld [vmem:[#allocation4 + $0x1a0] sm:$0xf]  ;;  %v1784_v45 = vld [vmem:[#allocation4 + $0x1a8] sm:$0xf0] }
  0x52   :  { %918 = vmatpush.bf16.msrb.mxu3 %v1566_v7 }
  0x53   :  { %894 = vmatpush.bf16.msra.mxu1 %v1350_v47  ;;  %v1521_v47 = vld [vmem:[#allocation4 + $0x218] sm:$0xf] }
  0x54   :  { %881 = vmatpush.bf16.msrb.mxu0 %v1254_v60  ;;  %907 = vmatpush.bf16.msra.mxu2 %v1446_v0  ;;  %v1522_v54 = vor.u32 %v1799_v48, %v1521_v47  ;;  %v1402_v60 = vor.u32 %v1769_v53, %v1401_v52  ;;  %v85_v0 = vperm.slane %v2013_v11, 3  ;;  %v1485_v11 = vld [vmem:[#allocation4 + $0x1d0] sm:$0xf]  ;;  %v1605_v48 = vld [vmem:[#allocation4 + $0x2c0] sm:$0xf] }
  0x55   :  { %v1257_v52 = vld [vmem:[#allocation4 + $0x8] sm:$0xf] }
  0x56   :  { %919 = vmatpush.bf16.msrb.mxu3 %v1554_v10  ;;  %v1763_v10 = vld [vmem:[#allocation4 + $0x100] sm:$0xf0] }
  0x57   :  { %v1378_v19 = vor.u32 %v1763_v10, %v1377_v9  ;;  %v1834_v9 = vld [vmem:[#allocation6 + $0x38] sm:$0xff]  ;;  %v1833_v10 = vld [vmem:[#allocation6 + $0x30] sm:$0xff] }
  0x5a   :  { %920 = vmatpush.bf16.msrb.mxu3 %v1542_v15  ;;  %v1293_v15 = vld [vmem:[#allocation4 + $0x50] sm:$0xf] }
  0x93   :  { %v136_v17 = vpop.f32.mrf.mxu1 }
  0x94   :  { %v137_v18 = vadd.f32 %v136_v17, %v83_v16  ;;  %v1742_v16 = vld [vmem:[#allocation4 + $0x58] sm:$0xf0] }
  0x95   :  { %v1790_v17 = vld [vmem:[#allocation4 + $0x1d8] sm:$0xf0] }
  0x96   :  { %v167_v22 = vmax.f32 %v137_v18, 0.0  ;;  %v1486_v26 = vor.u32 %v1790_v17, %v1485_v11  ;;  %v1828_v11 = vld [vmem:[#allocation6 + $0x8] sm:$0xff] }
  0x97   :  { %v1840_v17 = vld [vmem:[#allocation6 + $0x68] sm:$0xff] }
  0x98   :  { %v2018_v12 = vpack.c.bf16 %v167_v22, %v167_v22  ;;  %v123_v25 = vpop.f32.mrf.mxu3  ;;  %v1365_v22 = vld [vmem:[#allocation4 + $0xe0] sm:$0xf] }
  0x99   :  { %v124_v28 = vadd.f32 %v123_v25, %v82_v21  ;;  %v1826_v21 = vld [vmem:[#allocation4 + $0x2f8] sm:$0xf0]  ;;  %v1294_v25 = vor.u32 %v1742_v16, %v1293_v15  ;;  %v1829_v15 = vld [vmem:[#allocation6 + $0x10] sm:$0xff] }
  0x9a   :  { %v149_v29 = vpop.f32.mrf.mxu2  ;;  %843 = vmatmul.bf16.vlgmr.msrb.gmra.mxu1 %v2018_v12  ;;  %v1841_v16 = vld [vmem:[#allocation6 + $0x70] sm:$0xff] }
  0x9b   :  { %v150_v32 = vadd.f32 %v149_v29, %v84_v23  ;;  %v166_v35 = vmax.f32 %v124_v28, 0.0  ;;  %939 = vmatpush.bf16.msrb.mxu1 %v1438_v24  ;;  %v138_v37 = vpop.f32.mrf.mxu1  ;;  %v1760_v23 = vld [vmem:[#allocation4 + $0xe8] sm:$0xf0]  ;;  %v1630_v28 = vor.u32 %v1826_v21, %v1629_v20  ;;  %v1739_v29 = vld [vmem:[#allocation4 + $0x40] sm:$0xf0]  ;;  %v1838_v21 = vld [vmem:[#allocation6 + $0x58] sm:$0xff] }
  0x9c   :  { %v1757_v37 = vld [vmem:[#allocation4 + $0xd0] sm:$0xf0] }
  0x9d   :  { %v168_v38 = vmax.f32 %v150_v32, 0.0  ;;  %v2021_v42 = vpack.c.bf16 %v166_v35, %v166_v35  ;;  %v1366_v32 = vor.u32 %v1760_v23, %v1365_v22  ;;  %v1850_v22 = vld [vmem:[#allocation6 + $0xb8] sm:$0xff] }
  0x9f   :  { %v2023_v46 = vpack.c.bf16 %v168_v38, %v168_v38  ;;  %940 = vmatpush.bf16.msrb.mxu1 %v1426_v36  ;;  %830 = vmatmul.bf16.vlgmr.msra.gmra.mxu0 %v2021_v42  ;;  %v1353_v36 = vld [vmem:[#allocation4 + $0xc8] sm:$0xf]  ;;  %v1282_v38 = vor.u32 %v1739_v29, %v1281_v27 }
  0xa0   :  { %v125_v50 = vpop.f32.mrf.mxu3  ;;  %926 = vmatpush.bf16.msra.mxu0 %v1342_v39  ;;  %v1474_v39 = vor.u32 %v1787_v31, %v1473_v30  ;;  %v1354_v47 = vor.u32 %v1757_v37, %v1353_v36  ;;  %v1836_v27 = vld [vmem:[#allocation6 + $0x48] sm:$0xff]  ;;  %v302_v30 = vld [vmem:[%s2052_s4] sm:$0x7]  ;;  %v1846_v36 = vld [vmem:[#allocation6 + $0x98] sm:$0xff] }
  0xa1   :  { %856 = vmatmul.bf16.vlgmr.msrb.gmra.mxu2 %v2023_v46  ;;  %v304_v34 = vperm.slane %v302_v30, 0 }
  0xa2   :  { %952 = vmatpush.bf16.msrb.mxu2 %v1534_v43  ;;  %v151_v55 = vpop.f32.mrf.mxu2  ;;  %v1736_v43 = vld [vmem:[#allocation4 + $0x28] sm:$0xf0] }
  0xa3   :  { %941 = vmatpush.bf16.msrb.mxu1 %v1414_v49  ;;  %v1820_v49 = vld [vmem:[#allocation4 + $0x2c8] sm:$0xf0]  ;;  %v1270_v50 = vor.u32 %v1736_v43, %v1269_v40  ;;  %v1449_v55 = vld [vmem:[#allocation4 + $0x188] sm:$0xf] }
  0xa4   :  { %927 = vmatpush.bf16.msra.mxu0 %v1330_v51  ;;  %v1462_v51 = vor.u32 %v1784_v45, %v1461_v44  ;;  %v1606_v53 = vor.u32 %v1820_v49, %v1605_v48 }
  0xa6   :  { %953 = vmatpush.bf16.msrb.mxu2 %v1522_v54  ;;  %v1733_v54 = vld [vmem:[#allocation4 + $0x10] sm:$0xf0] }
  0xa7   :  { %942 = vmatpush.bf16.msrb.mxu1 %v1402_v60  ;;  %v1258_v59 = vor.u32 %v1733_v54, %v1257_v52  ;;  %v1450_v60 = vor.u32 %v1781_v56, %v1449_v55  ;;  %v1843_v52 = vld [vmem:[#allocation6 + $0x80] sm:$0xff] }
  0xa8   :  { %v162_v7 = vpop.f32.mrf.mxu3  ;;  %928 = vmatpush.bf16.msra.mxu0 %v1318_v61  ;;  %v1594_v61 = vor.u32 %v1817_v58, %v1593_v57 }
  0xa9   :  { %v163_v13 = vadd.f32 %v162_v7, %v85_v0  ;;  %v1582_v0 = vor.u32 %v1814_v63, %v1581_v62  ;;  %v1805_v7 = vld [vmem:[#allocation4 + $0x250] sm:$0xf0] }
  0xaa   :  { %954 = vmatpush.bf16.msrb.mxu2 %v1510_v1  ;;  %895 = vmatmul.bf16.vlgmr.msra.gmra.mxu1 %v2018_v12  ;;  %v1569_v1 = vld [vmem:[#allocation4 + $0x278] sm:$0xf] }
  0xab   :  { %v169_v18 = vmax.f32 %v163_v13, 0.0  ;;  %943 = vmatpush.bf16.msrb.mxu1 %v1390_v6  ;;  %v1570_v3 = vor.u32 %v1811_v2, %v1569_v1  ;;  %v1545_v6 = vld [vmem:[#allocation4 + $0x248] sm:$0xf]  ;;  %v1830_v13 = vld [vmem:[#allocation6 + $0x18] sm:$0xff] }
  0xac   :  { %929 = vmatpush.bf16.msra.mxu0 %v1306_v8  ;;  %v1546_v8 = vor.u32 %v1805_v7, %v1545_v6 }
  0xad   :  { %v2029_v24 = vpack.c.bf16 %v169_v18, %v169_v18  ;;  %v1827_v18 = vld [vmem:[#allocation6] sm:$0xff] }
  0xae   :  { %955 = vmatpush.bf16.msrb.mxu2 %v1498_v14  ;;  %v1842_v14 = vld [vmem:[#allocation6 + $0x78] sm:$0xff] }
  0xaf   :  { %944 = vmatpush.bf16.msrb.mxu1 %v1378_v19  ;;  %869 = vmatmul.bf16.vlgmr.msra.gmra.mxu3 %v2029_v24  ;;  %v1839_v19 = vld [vmem:[#allocation6 + $0x60] sm:$0xff] }
  0xb0   :  { %882 = vmatmul.bf16.vlgmr.msrb.gmra.mxu0 %v2021_v42  ;;  %v164_v35 = vpop.f32.mrf.mxu3  ;;  %965 = vmatpush.bf16.msra.mxu3 %v1630_v28  ;;  %v1848_v28 = vld [vmem:[#allocation6 + $0xa8] sm:$0xff] }
  0xb1   :  { %908 = vmatmul.bf16.vlgmr.msra.gmra.mxu2 %v2023_v46  ;;  %930 = vmatpush.bf16.msra.mxu0 %v1294_v25  ;;  %v1849_v25 = vld [vmem:[#allocation6 + $0xb0] sm:$0xff] }
  0xb2   :  { %956 = vmatpush.bf16.msrb.mxu2 %v1486_v26 }
  0xb3   :  { %945 = vmatpush.bf16.msrb.mxu1 %v1366_v32  ;;  %v1835_v32 = vld [vmem:[#allocation6 + $0x40] sm:$0xff] }
  0xb4   :  { %966 = vmatpush.bf16.msra.mxu3 %v1618_v41 }
  0xb5   :  { %931 = vmatpush.bf16.msra.mxu0 %v1282_v38 }
  0xb6   :  { %957 = vmatpush.bf16.msrb.mxu2 %v1474_v39  ;;  %v1845_v39 = vld [vmem:[#allocation6 + $0x90] sm:$0xff] }
  0xb7   :  { %946 = vmatpush.bf16.msrb.mxu1 %v1354_v47  ;;  %v1844_v47 = vld [vmem:[#allocation6 + $0x88] sm:$0xff] }
  0xb8   :  { %967 = vmatpush.bf16.msra.mxu3 %v1606_v53  ;;  %v305_v53 = vperm.slane %v302_v30, 1 }
  0xb9   :  { %932 = vmatpush.bf16.msra.mxu0 %v1270_v50 }
  0xba   :  { %958 = vmatpush.bf16.msrb.mxu2 %v1462_v51  ;;  %947 = vmatmul.bf16.vlgmr.msrb.gmra.mxu1 %v2018_v12  ;;  %v1558_v12 = vor.u32 %v1808_v5, %v1557_v4  ;;  %v306_v5 = vperm.slane %v302_v30, 2 }
  0xbb   :  { %1193 = vmatpush.bf16.msra.mxu1 %v1842_v14 }
  0xbc   :  { %968 = vmatpush.bf16.msra.mxu3 %v1594_v61 }
  0xbd   :  { %933 = vmatpush.bf16.msra.mxu0 %v1258_v59 }
  0xbe   :  { %959 = vmatpush.bf16.msrb.mxu2 %v1450_v60 }
  0xbf   :  { %921 = vmatmul.bf16.vlgmr.msrb.gmra.mxu3 %v2029_v24  ;;  %1194 = vmatpush.bf16.msra.mxu1 %v1841_v16 }
  0xc0   :  { %934 = vmatmul.bf16.vlgmr.msra.gmra.mxu0 %v2021_v42  ;;  %969 = vmatpush.bf16.msra.mxu3 %v1582_v0  ;;  %v1832_v42 = vld [vmem:[#allocation6 + $0x28] sm:$0xff] }
  0xc1   :  { %960 = vmatmul.bf16.vlgmr.msrb.gmra.mxu2 %v2023_v46  ;;  %1180 = vmatpush.bf16.msrb.mxu0 %v1834_v9  ;;  %v1831_v46 = vld [vmem:[#allocation6 + $0x20] sm:$0xff] }
  0xc2   :  { %1206 = vmatpush.bf16.msra.mxu2 %v1850_v22 }
  0xc3   :  { %1195 = vmatpush.bf16.msra.mxu1 %v1840_v17 }
  0xc4   :  { %970 = vmatpush.bf16.msra.mxu3 %v1570_v3 }
  0xc5   :  { %1181 = vmatpush.bf16.msrb.mxu0 %v1833_v10 }
  0xc6   :  { %1207 = vmatpush.bf16.msra.mxu2 %v1849_v25 }
  0xc7   :  { %1196 = vmatpush.bf16.msra.mxu1 %v1839_v19 }
  0xc8   :  { %971 = vmatpush.bf16.msra.mxu3 %v1558_v12 }
  0xc9   :  { %1182 = vmatpush.bf16.msrb.mxu0 %v1832_v42 }
  0xca   :  { %1208 = vmatpush.bf16.msra.mxu2 %v1848_v28 }
  0xcb   :  { %1197 = vmatpush.bf16.msra.mxu1 %v1838_v21 }
  0xcc   :  { %972 = vmatpush.bf16.msra.mxu3 %v1546_v8 }
  0xcd   :  { %1183 = vmatpush.bf16.msrb.mxu0 %v1831_v46 }
  0xce   :  { %1209 = vmatpush.bf16.msra.mxu2 %v1847_v33 }
  0xcf   :  { %973 = vmatmul.bf16.vlgmr.msra.gmra.mxu3 %v2029_v24  ;;  %v1837_v24 = vld [vmem:[#allocation6 + $0x50] sm:$0xff] }
  0xd0   :  { %1198 = vmatpush.bf16.msra.mxu1 %v1837_v24 }
  0xd1   :  { %1184 = vmatpush.bf16.msrb.mxu0 %v1830_v13 }
  0xd2   :  { %1210 = vmatpush.bf16.msra.mxu2 %v1846_v36 }
  0xd4   :  { %1199 = vmatpush.bf16.msra.mxu1 %v1836_v27 }
  0xd5   :  { %1185 = vmatpush.bf16.msrb.mxu0 %v1829_v15 }
  0xd6   :  { %1211 = vmatpush.bf16.msra.mxu2 %v1845_v39 }
  0xd8   :  { %1200 = vmatpush.bf16.msra.mxu1 %v1835_v32 }
  0xd9   :  { %1186 = vmatpush.bf16.msrb.mxu0 %v1828_v11 }
  0xda   :  { %1212 = vmatpush.bf16.msra.mxu2 %v1844_v47 }
  0xdd   :  { %1187 = vmatpush.bf16.msrb.mxu0 %v1827_v18  ;;  %v1860_v18 = vld [vmem:[%s2054_s6] ss:$0 sm:$0xff] }
  0xde   :  { %1213 = vmatpush.bf16.msra.mxu2 %v1843_v52 }
 0x117   :  { %v844_v20 = vpop.f32.mrf.mxu1 }
 0x11c   :  { %v831_v23 = vpop.f32.mrf.mxu0 }
 0x11d   :  { %v832_v37 = vadd.f32 %v831_v23, %v304_v34 }
 0x11f   :  { %v846_v26 = vpop.f32.mrf.mxu1  ;;  %v845_v41 = vadd.f32 %v844_v20, %v832_v37 }
 0x124   :  { %v857_v29 = vpop.f32.mrf.mxu2  ;;  %v833_v31 = vpop.f32.mrf.mxu0 }
 0x125   :  { %v858_v44 = vadd.f32 %v857_v29, %v845_v41 }
 0x127   :  { %v896_v35 = vpop.f32.mrf.mxu1 }
 0x12c   :  { %v859_v38 = vpop.f32.mrf.mxu2 }
 0x12d   :  { %v883_v40 = vpop.f32.mrf.mxu0 }
 0x12e   :  { %v884_v57 = vadd.f32 %v883_v40, %v305_v53 }
 0x12f   :  { %v898_v43 = vpop.f32.mrf.mxu1 }
 0x130   :  { %v897_v60 = vadd.f32 %v896_v35, %v884_v57 }
 0x132   :  { %v870_v45 = vpop.f32.mrf.mxu3 }
 0x133   :  { %v871_v48 = vadd.f32 %v870_v45, %v858_v44 }
 0x134   :  { %v909_v49 = vpop.f32.mrf.mxu2 }
 0x135   :  { %v978_v50 = vmax.f32 %v871_v48, 0.0  ;;  %v885_v51 = vpop.f32.mrf.mxu0  ;;  %v910_v62 = vadd.f32 %v909_v49, %v897_v60 }
 0x137   :  { %v981_v54 = vpack.c.bf16 %v978_v50, %v978_v50  ;;  %v948_v55 = vpop.f32.mrf.mxu1 }
 0x139   :  { %1188 = vmatmul.bf16.vlgmr.msrb.gmra.mxu0 %v981_v54 }
 0x13a   :  { %v872_v56 = vpop.f32.mrf.mxu3 }
 0x13c   :  { %v911_v58 = vpop.f32.mrf.mxu2 }
 0x13d   :  { %v935_v59 = vpop.f32.mrf.mxu0 }
 0x13e   :  { %v936_v7 = vadd.f32 %v935_v59, %v306_v5 }
 0x13f   :  { %v950_v61 = vpop.f32.mrf.mxu1 }
 0x140   :  { %v949_v8 = vadd.f32 %v948_v55, %v936_v7 }
 0x142   :  { %v922_v63 = vpop.f32.mrf.mxu3 }
 0x143   :  { %v923_v0 = vadd.f32 %v922_v63, %v910_v62 }
 0x144   :  { %v961_v1 = vpop.f32.mrf.mxu2 }
 0x145   :  { %v979_v2 = vmax.f32 %v923_v0, 0.0  ;;  %v937_v3 = vpop.f32.mrf.mxu0  ;;  %v962_v9 = vadd.f32 %v961_v1, %v949_v8 }
 0x147   :  { %v982_v4 = vpack.c.bf16 %v979_v2, %v979_v2 }
 0x149   :  { %1201 = vmatmul.bf16.vlgmr.msra.gmra.mxu1 %v982_v4 }
 0x14a   :  { %v924_v12 = vpop.f32.mrf.mxu3 }
 0x14c   :  { %v963_v6 = vpop.f32.mrf.mxu2 }
 0x152   :  { %v974_v10 = vpop.f32.mrf.mxu3 }
 0x153   :  { %v975_v42 = vadd.f32 %v974_v10, %v962_v9 }
 0x155   :  { %v980_v46 = vmax.f32 %v975_v42, 0.0 }
 0x157   :  { %v983_v13 = vpack.c.bf16 %v980_v46, %v980_v46 }
 0x159   :  { %1214 = vmatmul.bf16.vlgmr.msra.gmra.mxu2 %v983_v13 }
 0x15a   :  { %v976_v14 = vpop.f32.mrf.mxu3 }
 0x1b6   :  { %v1189_v15 = vpop.f32.mrf.mxu0 }
 0x1b7   :  { %v1190_v19 = vadd.f32 %v1860_v18, %v1189_v15 }
 0x1be   :  { %v1191_v16 = vpop.f32.mrf.mxu0 }
 0x1c6   :  { %v1202_v11 = vpop.f32.mrf.mxu1 }
 0x1c7   :  { %v1203_v20 = vadd.f32 %v1202_v11, %v1190_v19 }
 0x1ce   :  { %v1204_v17 = vpop.f32.mrf.mxu1 }
 0x1dc   :  { %v1215_v21 = vpop.f32.mrf.mxu2 }
 0x1dd   :  { %v1216_v22 = vadd.f32 %v1215_v21, %v1203_v20 }
 0x1df   :  { %1861 = vtanh.f32 %v1216_v22 }
 0x1e4   :  { %v1217_v23 = vpop.f32.mrf.mxu2 }
 0x1e5   :  { %v1862_v24 = vpop.eup %1861 }
 0x1e6   :  { %1220 = vst [vmem:[%s2055_s7] sm:$0xff] %v1862_v24 }
 0x1e7   :  { %1225 = vsyncpa [#allocation3], 1 }
 0x1e8   :  { %1226 = vsyncpa [#allocation5], 1 }

</bundles_post_ra>
